<compile_context>
chip_gen: v7x
topology: tpu7x:2x2x1
jax: 0.10.0
libtpu: 0.0.40
codegen_flags: <defaults>
</compile_context>

<pallas_src>
import functools
import math

import jax
import jax.numpy as jnp
from jax import lax
from jax.experimental import pallas as pl
from jax.experimental.pallas import tpu as pltpu


def _round_up(x, m):
    return (x + m - 1) // m * m


def _cdiv(a, b):
    return (a + b - 1) // b


def _gelu_exact(x):
    # nn.GELU() default: exact (erf) formulation, computed in f32.
    return 0.5 * x * (1.0 + lax.erf(x * (1.0 / math.sqrt(2.0))))


def _vmem_capacity_bytes():
    try:
        return int(pltpu.get_tpu_info().vmem_capacity_bytes)
    except Exception:
        return 64 << 20  # conservative fallback (v7x per-TensorCore)


def _pick_th(H, target):
    """Largest multiple-of-128 divisor of H that is <= target, else H (no tiling)."""
    cand = (min(target, H) // 128) * 128
    while cand >= 128:
        if H % cand == 0:
            return cand
        cand -= 128
    return H


def _moe_kernel(ids_ref, cnt_ref, x_ref, cw_ref, w1_ref, b1_ref, w2_ref,
                o_ref, acc_ref, *, approx_gelu):
    # grid = (row_tiles, expert_slots, hidden_tiles)
    # ids_ref : (row_tiles*E,) int32 SMEM   cnt_ref: (row_tiles,) int32 SMEM
    # x_ref   : (tm, C)  bf16               cw_ref : (tm, 1) f32
    # w1_ref  : (C, th)  bf16               b1_ref : (1, th) f32
    # w2_ref  : (th, C)  bf16
    # o_ref   : (tm, C)  out dtype          acc_ref: (tm, C) f32 scratch
    i = pl.program_id(0)
    e = pl.program_id(1)
    k = pl.program_id(2)
    n_e = pl.num_programs(1)
    n_k = pl.num_programs(2)

    @pl.when(jnp.logical_and(e == 0, k == 0))
    def _():
        acc_ref[...] = jnp.zeros_like(acc_ref)

    # Only the first cnt[i] expert slots of this row tile are real.  Padded
    # slots repeat the previous block indices (so their weight DMAs are
    # elided by the pipeline) and their compute is skipped here.
    @pl.when(e < cnt_ref[i])
    def _():
        # First matmul: bf16 operands on the MXU, f32 accumulate.
        h = jnp.dot(x_ref[...], w1_ref[...], preferred_element_type=jnp.float32)
        h = h + b1_ref[...]
        if approx_gelu:
            h = jax.nn.gelu(h, approximate=True)   # EUP tanh path (opt-in)
        else:
            h = _gelu_exact(h)                     # exact erf (PyTorch parity)
        # Fold the combine weight into h ((tm, th) multiply, cheaper than a
        # (tm, C) multiply) so the accumulator update is a pure add.
        hw = (cw_ref[...] * h).astype(w2_ref.dtype)
        acc_ref[...] += jnp.dot(hw, w2_ref[...],
                                preferred_element_type=jnp.float32)

    @pl.when(jnp.logical_and(e == n_e - 1, k == n_k - 1))
    def _():
        o_ref[...] = acc_ref[...].astype(o_ref.dtype)


def moe_pallas(x, gate_w, lb_bias, w1, b1, w2, b2, *, n_shared_experts,
               n_routed_experts_per_token, tm_max=None, th_max=None,
               compute_dtype=jnp.bfloat16, approx_gelu=False):
    """x: (B,T,C); gate_w: (C,E_routed); w1: (E,C,H); b1: (E,H); w2: (E,H,C); b2: (E,C)."""
    B, T, C = x.shape
    E, C2, H = w1.shape
    assert C2 == C
    M = B * T
    out_dtype = x.dtype
    out_it = jnp.dtype(out_dtype).itemsize
    cd_it = jnp.dtype(compute_dtype).itemsize

    x2d = x.reshape(M, C)

    # ---- routing (tiny; plain JAX in f32) -------------------------------
    # TODO(synk): top-k / softmax routing stays in XLA; no clean Pallas topk.
    xf = x2d.astype(jnp.float32)
    routed_logits = jnp.dot(xf, gate_w.astype(jnp.float32))         # (M, E_routed)
    selection_logits = routed_logits + lb_bias.astype(jnp.float32)
    _, top_idx = lax.top_k(selection_logits, n_routed_experts_per_token)
    routed_probs = jax.nn.softmax(routed_logits, axis=-1)           # over ALL routed
    top_w = jnp.take_along_axis(routed_probs, top_idx, axis=-1)     # (M, k) no renorm

    # Dense per-(token, expert) combine weights.
    combine = jnp.zeros((M, E), jnp.float32).at[:, :n_shared_experts].set(1.0)
    onehot = jax.nn.one_hot(top_idx + n_shared_experts, E, dtype=jnp.float32)
    combine = combine + jnp.einsum("mk,mke->me", top_w, onehot)

    # Expert output bias hoisted out of the kernel: sum_e combine[m,e] * b2[e].
    bias_comb = jnp.dot(combine, b2.astype(jnp.float32))            # (M, C) f32

    # ---- per-generation tile selection -----------------------------------
    vmem_cap = _vmem_capacity_bytes()
    if vmem_cap >= (100 << 20):          # v5e / v6e: 128 MiB physical VMEM
        tm_target, th_target = 1024, 1024
    else:                                # v7x-like: 64 MiB per TensorCore
        tm_target, th_target = 512, 512
    if tm_max is not None:
        tm_target = tm_max
    if th_max is not None:
        th_target = th_max

    th = _pick_th(H, th_target)
    tm = _round_up(min(tm_target, _round_up(M, 16)), 16)

    def _ws_bytes(tm_, th_):
        # Actual double-buffered working set of the pipeline.
        return (2 * tm_ * C * cd_it            # x tile (double-buffered)
                + 2 * tm_ * 1 * 4              # combine weights
                + 2 * C * th_ * cd_it          # W1 chunk
                + 2 * 1 * th_ * 4              # b1 chunk
                + 2 * th_ * C * cd_it          # W2 chunk
                + 2 * tm_ * C * out_it         # output tile
                + tm_ * C * 4)                 # f32 accumulator (single)

    budget = int(0.70 * vmem_cap)
    # Shrink th first (only per-step overhead), then tm (which sets the
    # weight-streaming arithmetic intensity).
    while _ws_bytes(tm, th) > budget and th != H and th > 128:
        nxt = _pick_th(H, th - 128)
        if nxt >= th:
            break
        th = nxt
    while _ws_bytes(tm, th) > budget and tm > 128:
        tm = max(128, _round_up(tm // 2, 16))

    # v7x has 2 TensorCores: make sure the "parallel" row axis has >= 2 tiles.
    if vmem_cap < (100 << 20):
        while M > 256 and _cdiv(M, tm) < 2 and tm > 128:
            tm = max(128, _round_up(_cdiv(tm, 2), 16))

    Mp = _round_up(M, tm)
    n_tiles = Mp // tm
    n_k = H // th

    if Mp != M:
        x2d = jnp.pad(x2d, ((0, Mp - M), (0, 0)))
        combine_p = jnp.pad(combine, ((0, Mp - M), (0, 0)))  # padded rows -> weight 0
    else:
        combine_p = combine

    x_c = x2d.astype(compute_dtype)
    w1_c = w1.astype(compute_dtype)                    # (E, C, H)
    w2_c = w2.astype(compute_dtype)                    # (E, H, C)
    b1_c = b1.reshape(E, 1, H).astype(jnp.float32)     # (E, 1, H)
    cw = jnp.transpose(combine_p)[:, :, None]          # (E, Mp, 1) f32

    # ---- per-row-tile active-expert schedule (scalar prefetch) -----------
    tile_active = (combine_p.reshape(n_tiles, tm, E) > 0.0).any(axis=1)   # (n_tiles, E)
    counts = jnp.maximum(tile_active.sum(axis=-1), 1).astype(jnp.int32)   # (n_tiles,)
    keys = jnp.where(tile_active, 0, E) + jnp.arange(E)[None, :]
    sorted_ids = jnp.argsort(keys, axis=-1)            # active expert ids first
    slot = jnp.minimum(jnp.arange(E)[None, :], counts[:, None] - 1)
    active_ids = jnp.take_along_axis(sorted_ids, slot, axis=-1).astype(jnp.int32)
    ids_flat = active_ids.reshape(-1)                  # (n_tiles * E,), padded slots
                                                       # repeat the last active id

    # ---- index maps (receive the scalar-prefetch refs positionally) ------
    def _x_map(i, e, k, ids, cnt):
        return (i, 0)

    def _cw_map(i, e, k, ids, cnt):
        return (ids[i * E + e], i, 0)

    def _freeze_k(i, e, k, cnt):
        # Padded slots also freeze the hidden-chunk index so the weight block
        # indices do not change and the DMA is elided.
        a = (e < cnt[i]).astype(jnp.int32)
        return a * k + (1 - a) * (n_k - 1)

    def _w1_map(i, e, k, ids, cnt):
        return (ids[i * E + e], 0, _freeze_k(i, e, k, cnt))

    def _b1_map(i, e, k, ids, cnt):
        return (ids[i * E + e], 0, _freeze_k(i, e, k, cnt))

    def _w2_map(i, e, k, ids, cnt):
        return (ids[i * E + e], _freeze_k(i, e, k, cnt), 0)

    def _o_map(i, e, k, ids, cnt):
        return (i, 0)

    # ---- cost / VMEM accounting ------------------------------------------
    ws = _ws_bytes(tm, th)
    vmem_limit = int(min(vmem_cap, max(ws + (8 << 20), 32 << 20)))

    flops = 4 * Mp * E * C * H                         # dense upper bound
    transc = Mp * E * H
    bytes_accessed = int(Mp * C * cd_it                # x
                         + n_tiles * E * 2 * C * H * cd_it   # weights re-streamed per row tile
                         + E * Mp * 4                  # combine weights
                         + Mp * C * out_it)            # output

    kernel = functools.partial(_moe_kernel, approx_gelu=approx_gelu)
    out2d = pl.pallas_call(
        kernel,
        out_shape=jax.ShapeDtypeStruct((Mp, C), out_dtype),
        grid_spec=pltpu.PrefetchScalarGridSpec(
            num_scalar_prefetch=2,
            grid=(n_tiles, E, n_k),
            in_specs=[
                pl.BlockSpec((tm, C), _x_map),            # x rows (reused over e,k)
                pl.BlockSpec((None, tm, 1), _cw_map),     # combine weights
                pl.BlockSpec((None, C, th), _w1_map),     # W1 chunk
                pl.BlockSpec((None, 1, th), _b1_map),     # b1 chunk
                pl.BlockSpec((None, th, C), _w2_map),     # W2 chunk
            ],
            out_specs=pl.BlockSpec((tm, C), _o_map),
            scratch_shapes=[pltpu.VMEM((tm, C), jnp.float32)],
        ),
        compiler_params=pltpu.CompilerParams(
            dimension_semantics=("parallel", "arbitrary", "arbitrary"),
            vmem_limit_bytes=vmem_limit,
        ),
        cost_estimate=pl.CostEstimate(
            flops=flops, transcendentals=transc, bytes_accessed=bytes_accessed),
    )(ids_flat, counts, x_c, cw, w1_c, b1_c, w2_c)

    out = (out2d[:M].astype(jnp.float32) + bias_comb).astype(out_dtype)
    out = out.reshape(B, T, C)
    # TODO(synk): dropout (eval-mode identity) and training-time
    # load_balancing_bias update are not implemented (inference forward only).
    return out, None


# ---------------------------- pure-JAX reference ----------------------------
def _mlp_ref(xf, w1_e, b1_e, w2_e, b2_e):
    h = xf @ w1_e.astype(jnp.float32) + b1_e.astype(jnp.float32)
    h = _gelu_exact(h)
    return h @ w2_e.astype(jnp.float32) + b2_e.astype(jnp.float32)


def moe_reference(x, gate_w, lb_bias, w1, b1, w2, b2, n_shared, k_routed):
    B, T, C = x.shape
    E = w1.shape[0]
    xf = x.reshape(-1, C).astype(jnp.float32)
    shared = jnp.zeros_like(xf)
    for e in range(n_shared):
        shared = shared + _mlp_ref(xf, w1[e], b1[e], w2[e], b2[e])
    logits = xf @ gate_w.astype(jnp.float32)
    sel = logits + lb_bias.astype(jnp.float32)
    _, top_idx = lax.top_k(sel, k_routed)
    probs = jax.nn.softmax(logits, axis=-1)
    top_w = jnp.take_along_axis(probs, top_idx, axis=-1)
    routed = jnp.zeros_like(xf)
    for e in range(n_shared, E):
        w_e = jnp.where(top_idx + n_shared == e, top_w, 0.0).sum(-1)   # (M,)
        routed = routed + w_e[:, None] * _mlp_ref(xf, w1[e], b1[e], w2[e], b2[e])
    return (shared + routed).reshape(B, T, C)


def _make_inputs(key, B, T, C, H, n_experts, n_routed):
    kx, kg, kw1, kb1, kw2, kb2 = jax.random.split(key, 6)
    x = jax.random.normal(kx, (B, T, C), dtype=jnp.float32)
    gate_w = jax.random.normal(kg, (C, n_routed), dtype=jnp.float32) / math.sqrt(C)
    lb_bias = jnp.zeros((n_routed,), jnp.float32)
    w1 = jax.random.normal(kw1, (n_experts, C, H), dtype=jnp.float32) / math.sqrt(C)
    b1 = jax.random.normal(kb1, (n_experts, H), dtype=jnp.float32) * 0.02
    w2 = jax.random.normal(kw2, (n_experts, H, C), dtype=jnp.float32) / math.sqrt(H)
    b2 = jax.random.normal(kb2, (n_experts, C), dtype=jnp.float32) * 0.02
    return x, gate_w, lb_bias, w1, b1, w2, b2


def _check(out, ref):
    err = float(jnp.max(jnp.abs(out.astype(jnp.float32) - ref)))
    scale = float(jnp.max(jnp.abs(ref))) + 1e-6
    # bf16 MXU operands with f32 accumulation -> loose tolerance vs f32 reference.
    assert err <= 5e-2 * scale + 5e-3, f"mismatch vs reference: err={err}, scale={scale}"


if __name__ == "__main__":
    # Config analogue: n_embd=32, mlp_expansion_factor=4, bias=True, dropout=0.0,
    # n_experts=4, n_shared_experts=1, n_experts_per_token=3.
    B, T, C = 2, 8, 32
    H = C * 4
    n_experts, n_shared, n_per_token = 4, 1, 3
    assert n_per_token > n_shared
    n_routed = n_experts - n_shared
    k_routed = n_per_token - n_shared

    key = jax.random.PRNGKey(0)
    inputs = _make_inputs(key, B, T, C, H, n_experts, n_routed)
    out, _aux = moe_pallas(*inputs, n_shared_experts=n_shared,
                           n_routed_experts_per_token=k_routed)
    out = jax.block_until_ready(out)
    ref = moe_reference(*inputs, n_shared, k_routed)
    _check(out, ref)

    # Second (still small) config forcing multiple row tiles, hidden-dim tiling
    # and the scalar-prefetched expert-skipping path.
    B2, T2, C2 = 2, 24, 64
    H2 = C2 * 4
    n_experts2, n_shared2, n_per_token2 = 6, 1, 3
    n_routed2 = n_experts2 - n_shared2
    k_routed2 = n_per_token2 - n_shared2
    inputs2 = _make_inputs(jax.random.PRNGKey(0), B2, T2, C2, H2, n_experts2, n_routed2)
    out2, _ = moe_pallas(*inputs2, n_shared_experts=n_shared2,
                         n_routed_experts_per_token=k_routed2,
                         tm_max=16, th_max=128)
    out2 = jax.block_until_ready(out2)
    ref2 = moe_reference(*inputs2, n_shared2, k_routed2)
    _check(out2, ref2)

    print("KERNEL_OK")
</pallas_src>

<mosaic_0001>
module attributes {stable_mosaic.version = 11 : i64} {
  func.func @_moe_kernel(%arg0: i32, %arg1: i32, %arg2: i32, %arg3: memref<4xi32, #tpu.memory_space<smem>>, %arg4: memref<1xi32, #tpu.memory_space<smem>>, %arg5: memref<16x32xbf16, #tpu.memory_space<vmem>>, %arg6: memref<1x16x1xf32, #tpu.memory_space<vmem>>, %arg7: memref<1x32x128xbf16, #tpu.memory_space<vmem>>, %arg8: memref<1x1x128xf32, #tpu.memory_space<vmem>>, %arg9: memref<1x128x32xbf16, #tpu.memory_space<vmem>>, %arg10: memref<16x32xf32, #tpu.memory_space<vmem>>, %arg11: memref<16x32xf32, #tpu.memory_space<vmem>>) attributes {dimension_semantics = [#tpu.dimension_semantics<parallel>, #tpu.dimension_semantics<arbitrary>, #tpu.dimension_semantics<arbitrary>], iteration_bounds = array<i64: 1, 4, 1>, scalar_prefetch = 2 : i64, scratch_operands = 1 : i64, tpu.core_type = #tpu.core_type<tc>, window_params = [{transform_indices = @transform_0, window_bounds = array<i64: 16, 32>}, {transform_indices = @transform_1, window_bounds = array<i64: 1, 16, 1>}, {transform_indices = @transform_2, window_bounds = array<i64: 1, 32, 128>}, {transform_indices = @transform_3, window_bounds = array<i64: 1, 1, 128>}, {transform_indices = @transform_4, window_bounds = array<i64: 1, 128, 32>}, {transform_indices = @transform_5, window_bounds = array<i64: 16, 32>}]} {
    %c0_i32 = arith.constant 0 : i32
    %0 = arith.cmpi eq, %arg1, %c0_i32 : i32
    %c0_i32_0 = arith.constant 0 : i32
    %1 = arith.cmpi eq, %arg2, %c0_i32_0 : i32
    %2 = arith.andi %0, %1 : i1
    %3 = arith.extui %2 : i1 to i32
    %c0_i32_1 = arith.constant 0 : i32
    %4 = arith.cmpi ne, %3, %c0_i32_1 : i32
    scf.if %4 {
      %cst = arith.constant 0.000000e+00 : f32
      %15 = vector.broadcast %cst : f32 to vector<16x32xf32>
      %c0 = arith.constant 0 : index
      %c0_5 = arith.constant 0 : index
      %16 = vector.load %arg11[%c0, %c0_5] : memref<16x32xf32, #tpu.memory_space<vmem>>, vector<16x32xf32>
      tpu.vector_store %arg11[%c0, %c0_5], %15 {strides = array<i32>} : memref<16x32xf32, #tpu.memory_space<vmem>>, vector<16x32xf32>,
    } else {
    }
    %5 = arith.index_cast %arg0 : i32 to index
    %6 = memref.load %arg4[%5] : memref<1xi32, #tpu.memory_space<smem>>
    %7 = arith.cmpi slt, %arg1, %6 : i32
    %8 = arith.extui %7 : i1 to i32
    %c0_i32_2 = arith.constant 0 : i32
    %9 = arith.cmpi ne, %8, %c0_i32_2 : i32
    scf.if %9 {
      %c0 = arith.constant 0 : index
      %c0_5 = arith.constant 0 : index
      %15 = vector.load %arg5[%c0, %c0_5] : memref<16x32xbf16, #tpu.memory_space<vmem>>, vector<16x32xbf16>
      %c0_6 = arith.constant 0 : index
      %c0_7 = arith.constant 0 : index
      %c0_8 = arith.constant 0 : index
      %16 = vector.load %arg7[%c0_6, %c0_7, %c0_8] : memref<1x32x128xbf16, #tpu.memory_space<vmem>>, vector<1x32x128xbf16>
      %17 = vector.shape_cast %16 : vector<1x32x128xbf16> to vector<32x128xbf16>
      %cst = arith.constant dense<0.000000e+00> : vector<16x128xf32>
      %18 = tpu.matmul %15, %17, %cst {dimension_numbers = #tpu.dot_dimension_numbers<[1], [0], [0], [1], [0, 0, 1, 1], [], []>} : vector<16x32xbf16>, vector<32x128xbf16>, vector<16x128xf32> -> vector<16x128xf32>
      %c0_9 = arith.constant 0 : index
      %c0_10 = arith.constant 0 : index
      %c0_11 = arith.constant 0 : index
      %19 = vector.load %arg8[%c0_9, %c0_10, %c0_11] : memref<1x1x128xf32, #tpu.memory_space<vmem>>, vector<1x1x128xf32>
      %20 = vector.shape_cast %19 : vector<1x1x128xf32> to vector<1x128xf32>
      %21 = vector.broadcast %20 : vector<1x128xf32> to vector<16x128xf32>
      %22 = arith.addf %18, %21 : vector<16x128xf32>
      %cst_12 = arith.constant 5.000000e-01 : f32
      %23 = vector.broadcast %cst_12 : f32 to vector<16x128xf32>
      %24 = arith.mulf %23, %22 : vector<16x128xf32>
      %cst_13 = arith.constant 0.707106769 : f32
      %25 = vector.broadcast %cst_13 : f32 to vector<16x128xf32>
      %26 = arith.mulf %22, %25 : vector<16x128xf32>
      %27 = math.erf %26 : vector<16x128xf32>
      %cst_14 = arith.constant 1.000000e+00 : f32
      %28 = vector.broadcast %cst_14 : f32 to vector<16x128xf32>
      %29 = arith.addf %28, %27 : vector<16x128xf32>
      %30 = arith.mulf %24, %29 : vector<16x128xf32>
      %c0_15 = arith.constant 0 : index
      %c0_16 = arith.constant 0 : index
      %c0_17 = arith.constant 0 : index
      %31 = vector.load %arg6[%c0_15, %c0_16, %c0_17] : memref<1x16x1xf32, #tpu.memory_space<vmem>>, vector<1x16x1xf32>
      %32 = vector.shape_cast %31 : vector<1x16x1xf32> to vector<16x1xf32>
      %33 = vector.broadcast %32 : vector<16x1xf32> to vector<16x128xf32>
      %34 = arith.mulf %33, %30 : vector<16x128xf32>
      %35 = arith.truncf %34 : vector<16x128xf32> to vector<16x128xbf16>
      %c0_18 = arith.constant 0 : index
      %c0_19 = arith.constant 0 : index
      %36 = vector.load %arg11[%c0_18, %c0_19] : memref<16x32xf32, #tpu.memory_space<vmem>>, vector<16x32xf32>
      %c0_20 = arith.constant 0 : index
      %c0_21 = arith.constant 0 : index
      %c0_22 = arith.constant 0 : index
      %37 = vector.load %arg9[%c0_20, %c0_21, %c0_22] : memref<1x128x32xbf16, #tpu.memory_space<vmem>>, vector<1x128x32xbf16>
      %38 = vector.shape_cast %37 : vector<1x128x32xbf16> to vector<128x32xbf16>
      %cst_23 = arith.constant dense<0.000000e+00> : vector<16x32xf32>
      %39 = tpu.matmul %35, %38, %cst_23 {dimension_numbers = #tpu.dot_dimension_numbers<[1], [0], [0], [1], [0, 0, 1, 1], [], []>} : vector<16x128xbf16>, vector<128x32xbf16>, vector<16x32xf32> -> vector<16x32xf32>
      %40 = arith.addf %36, %39 : vector<16x32xf32>
      %c0_24 = arith.constant 0 : index
      %c0_25 = arith.constant 0 : index
      %41 = vector.load %arg11[%c0_24, %c0_25] : memref<16x32xf32, #tpu.memory_space<vmem>>, vector<16x32xf32>
      tpu.vector_store %arg11[%c0_24, %c0_25], %40 {strides = array<i32>} : memref<16x32xf32, #tpu.memory_space<vmem>>, vector<16x32xf32>,
    } else {
    }
    %c3_i32 = arith.constant 3 : i32
    %10 = arith.cmpi eq, %arg1, %c3_i32 : i32
    %c0_i32_3 = arith.constant 0 : i32
    %11 = arith.cmpi eq, %arg2, %c0_i32_3 : i32
    %12 = arith.andi %10, %11 : i1
    %13 = arith.extui %12 : i1 to i32
    %c0_i32_4 = arith.constant 0 : i32
    %14 = arith.cmpi ne, %13, %c0_i32_4 : i32
    scf.if %14 {
      %c0 = arith.constant 0 : index
      %c0_5 = arith.constant 0 : index
      %15 = vector.load %arg11[%c0, %c0_5] : memref<16x32xf32, #tpu.memory_space<vmem>>, vector<16x32xf32>
      %c0_6 = arith.constant 0 : index
      %c0_7 = arith.constant 0 : index
      %16 = vector.load %arg10[%c0_6, %c0_7] : memref<16x32xf32, #tpu.memory_space<vmem>>, vector<16x32xf32>
      tpu.vector_store %arg10[%c0_6, %c0_7], %15 {strides = array<i32>} : memref<16x32xf32, #tpu.memory_space<vmem>>, vector<16x32xf32>,
    } else {
    }
    return
  }
  func.func @transform_0(%arg0: i32, %arg1: i32, %arg2: i32, %arg3: memref<4xi32, #tpu.memory_space<smem>>, %arg4: memref<1xi32, #tpu.memory_space<smem>>) -> (i32, i32) {
    %c0_i32 = arith.constant 0 : i32
    %c0_i32_0 = arith.constant 0 : i32
    return %arg0, %c0_i32 : i32, i32
  }
  func.func @transform_1(%arg0: i32, %arg1: i32, %arg2: i32, %arg3: memref<4xi32, #tpu.memory_space<smem>>, %arg4: memref<1xi32, #tpu.memory_space<smem>>) -> (i32, i32, i32) {
    %c4_i32 = arith.constant 4 : i32
    %0 = arith.muli %arg0, %c4_i32 : i32
    %1 = arith.addi %0, %arg1 : i32
    %2 = arith.index_cast %1 : i32 to index
    %3 = memref.load %arg3[%2] : memref<4xi32, #tpu.memory_space<smem>>
    %c0_i32 = arith.constant 0 : i32
    %c0_i32_0 = arith.constant 0 : i32
    return %3, %arg0, %c0_i32 : i32, i32, i32
  }
  func.func @transform_2(%arg0: i32, %arg1: i32, %arg2: i32, %arg3: memref<4xi32, #tpu.memory_space<smem>>, %arg4: memref<1xi32, #tpu.memory_space<smem>>) -> (i32, i32, i32) {
    %c4_i32 = arith.constant 4 : i32
    %0 = arith.muli %arg0, %c4_i32 : i32
    %1 = arith.addi %0, %arg1 : i32
    %2 = arith.index_cast %1 : i32 to index
    %3 = memref.load %arg3[%2] : memref<4xi32, #tpu.memory_space<smem>>
    %4 = arith.index_cast %arg0 : i32 to index
    %5 = memref.load %arg4[%4] : memref<1xi32, #tpu.memory_space<smem>>
    %6 = arith.cmpi slt, %arg1, %5 : i32
    %7 = arith.extui %6 : i1 to i32
    %8 = arith.muli %7, %arg2 : i32
    %c1_i32 = arith.constant 1 : i32
    %9 = arith.subi %c1_i32, %7 : i32
    %c0_i32 = arith.constant 0 : i32
    %10 = arith.muli %9, %c0_i32 : i32
    %11 = arith.addi %8, %10 : i32
    %c0_i32_0 = arith.constant 0 : i32
    %c0_i32_1 = arith.constant 0 : i32
    return %3, %c0_i32_0, %11 : i32, i32, i32
  }
  func.func @transform_3(%arg0: i32, %arg1: i32, %arg2: i32, %arg3: memref<4xi32, #tpu.memory_space<smem>>, %arg4: memref<1xi32, #tpu.memory_space<smem>>) -> (i32, i32, i32) {
    %c4_i32 = arith.constant 4 : i32
    %0 = arith.muli %arg0, %c4_i32 : i32
    %1 = arith.addi %0, %arg1 : i32
    %2 = arith.index_cast %1 : i32 to index
    %3 = memref.load %arg3[%2] : memref<4xi32, #tpu.memory_space<smem>>
    %4 = arith.index_cast %arg0 : i32 to index
    %5 = memref.load %arg4[%4] : memref<1xi32, #tpu.memory_space<smem>>
    %6 = arith.cmpi slt, %arg1, %5 : i32
    %7 = arith.extui %6 : i1 to i32
    %8 = arith.muli %7, %arg2 : i32
    %c1_i32 = arith.constant 1 : i32
    %9 = arith.subi %c1_i32, %7 : i32
    %c0_i32 = arith.constant 0 : i32
    %10 = arith.muli %9, %c0_i32 : i32
    %11 = arith.addi %8, %10 : i32
    %c0_i32_0 = arith.constant 0 : i32
    %c0_i32_1 = arith.constant 0 : i32
    return %3, %c0_i32_0, %11 : i32, i32, i32
  }
  func.func @transform_4(%arg0: i32, %arg1: i32, %arg2: i32, %arg3: memref<4xi32, #tpu.memory_space<smem>>, %arg4: memref<1xi32, #tpu.memory_space<smem>>) -> (i32, i32, i32) {
    %c4_i32 = arith.constant 4 : i32
    %0 = arith.muli %arg0, %c4_i32 : i32
    %1 = arith.addi %0, %arg1 : i32
    %2 = arith.index_cast %1 : i32 to index
    %3 = memref.load %arg3[%2] : memref<4xi32, #tpu.memory_space<smem>>
    %4 = arith.index_cast %arg0 : i32 to index
    %5 = memref.load %arg4[%4] : memref<1xi32, #tpu.memory_space<smem>>
    %6 = arith.cmpi slt, %arg1, %5 : i32
    %7 = arith.extui %6 : i1 to i32
    %8 = arith.muli %7, %arg2 : i32
    %c1_i32 = arith.constant 1 : i32
    %9 = arith.subi %c1_i32, %7 : i32
    %c0_i32 = arith.constant 0 : i32
    %10 = arith.muli %9, %c0_i32 : i32
    %11 = arith.addi %8, %10 : i32
    %c0_i32_0 = arith.constant 0 : i32
    %c0_i32_1 = arith.constant 0 : i32
    return %3, %11, %c0_i32_0 : i32, i32, i32
  }
  func.func @transform_5(%arg0: i32, %arg1: i32, %arg2: i32, %arg3: memref<4xi32, #tpu.memory_space<smem>>, %arg4: memref<1xi32, #tpu.memory_space<smem>>) -> (i32, i32) {
    %c0_i32 = arith.constant 0 : i32
    %c0_i32_0 = arith.constant 0 : i32
    return %arg0, %c0_i32 : i32, i32
  }
}

</mosaic_0001>

<bundles_post_ra>
// kernel: tpu_custom_call.1
= control target key start
LH: loop header
LB: loop body
LE: loop exit
PB: predicated region body
PF: predicated region fallthrough
CT: control target
= control target key end

     0   :  { %s1272_s0 = inlined_call_operand.vmem [shape: s32[4], index: 0, kind: input, shape index: {}]   ;;  %s1273_s1 = inlined_call_operand.<no memory space> [shape: s32[1], index: 1, kind: input, shape index: {}]   ;;  %s1274_s2 = inlined_call_operand.vmem [shape: bf16[16,32], index: 2, kind: input, shape index: {}]   ;;  %s1275_s3 = inlined_call_operand.vmem [shape: f32[4,16,1], index: 3, kind: input, shape index: {}]   ;;  %s1276_s4 = inlined_call_operand.vmem [shape: bf16[4,32,128], index: 4, kind: input, shape index: {}]   ;;  %s1277_s5 = inlined_call_operand.vmem [shape: f32[4,1,128], index: 5, kind: input, shape index: {}]   ;;  %s1278_s6 = inlined_call_operand.vmem [shape: bf16[4,128,32], index: 6, kind: input, shape index: {}]   ;;  %s1279_s7 = inlined_call_operand.hbm [shape: f32[16,32], index: 7, kind: output, shape index: {}]  }
   0x1   :  { %s12_s26 = sshll.u32 %s1272_s0, 4  ;;  %16 = sst [smem:[#allocation5]] %s1273_s1  ;;  %s13_s26 = int_to_ptr.vmem [resolvable:$true] %s12_s26 }
   0x2   :  { %s1043_s29 = scalar_lea.vmem %s13_s26, 16  ;;  %p1048_p1 = scmp.lt.s32.totalorder %s13_s26, %s13_s26 }
   0x3   :  { %p1044_p0 = scmp.ne.s32.totalorder %s13_s26, %s1043_s29  ;;  %p1049_p2 = scmp.lt.s32.totalorder %s1043_s29, %s1043_s29 }
   0x5   :  { %p1050_p3 = por %p1049_p2, %p1048_p1 }
   0x7   :  { %p1051_p4 = pnand %p1050_p3, %p1044_p0 }
   0x9   :  { %1054 = shalt.err (!%p1051_p4)  }
   0xa   :  { %s1111_s30 = smov [#allocation4]  }
   0xb   :  { %15 = dma.vmem_to_smem %s13_s26, 16, %s1111_s30, [#allocation3] }
   0xc   :  { %1093 = dma.done.wait [#allocation3], 16 }
   0xd   :  { %1094 = vsyncadd [#allocation3], 4294967280 }
   0xe   :  { %18 = sfence }
   0xf   :  { %19 = vsyncpa [#allocation7], 0  ;;  %s1165_s8 = smov 0   ;;  %s1167_s0 = smov 0  }
  0x10   :  { %s1169_s9 = smov 0  }
  0x11 LB: > { %s913_s1 = sadd.s32 4294967295, %s1109_s9   ;;  %s40_s10 = sadd.s32 1, %s1105_s0  ;;  %s1109_s9 = sphi %s1169_s9, %s25_s9   ;;  %s1105_s0 = sphi %s1167_s0, %s1282_s0   ;;  %s1101_s8 = sphi %s1165_s8, %s1281_s8  }
  0x12   : > { %p42_p5 = scmp.ge.s32.totalorder %s40_s10, 4  ;;  %p917_p6 = scmp.ge.s32.totalorder %s1109_s9, 1 }
  0x13   : > { %p375_p7 = scmp.lt.s32.totalorder %s1109_s9, 5 }
  0x14   : > { %s1284_s10 = smov (%p42_p5, %s40_s10), 0 }
  0x15   : > { %p376_p8 = pnand %p917_p6, %p375_p7 }
  0x16   : > { %s462_s11 = sld [smem:[#allocation4 + %s1101_s8]] (!%p376_p8)  ;;  %p544_p9 = scmp.eq.s32.totalorder (!%p376_p8), %s1101_s8, 0 }
  0x17   : > { %379 = sbr.rel (%p376_p8) target bundleno = 548 (0x224), region = 40  ;;  %s478_s12 = sld [smem:[#allocation4 + %s1101_s8]] (!%p376_p8) }
  0x18   : > { %s500_s13 = sld [smem:[#allocation4 + %s1101_s8]] (!%p376_p8) }
  0x19   : > { %s520_s14 = sld [smem:[#allocation4 + %s1101_s8]] (!%p376_p8) }
  0x1c   : > { %p464_p10 = scmp.lt.s32.totalorder (!%p376_p8), %s462_s11, 3 }
  0x1d   : > { %p483_p11 = scmp.lt.s32.totalorder (!%p376_p8), %s478_s12, 3 }
  0x1e   : > { %p505_p12 = scmp.lt.s32.totalorder %s500_s13, 3  ;;  %s1286_s11 = smov (!%p464_p10, %s462_s11), 3  ;;  %vm550_vm0 = vcmask (%p544_p9), 261120   ;;  %v1112_v0 = vmov (%p544_p9), 0.0  }
  0x1f   : > { %s1288_s12 = smov (!%p483_p11, %s478_s12), 3  ;;  %s944_s15 = sshll.u32 %s1286_s11, 4  ;;  %551 = vst.msk [vmem:[#allocation2] sm:$0xff] (%p544_p9), %vm550_vm0, %v1112_v0  ;;  %552 = vst.msk [vmem:[#allocation2 + $0x8] sm:$0xff] (%p544_p9), %vm550_vm0, %v1112_v0 }
  0x20   : > { %p526_p13 = scmp.lt.s32.totalorder %s520_s14, 3  ;;  %s1194_s18 = scalar_lea.vmem %s1275_s3, %s944_s15 }
  0x21   : > { %s945_s19 = sshll.u32 %s1288_s12, 4  ;;  %s1290_s13 = smov (!%p505_p12, %s500_s13), 3 }
  0x22   : > { %s490_s22 = scalar_lea.vmem %s1276_s4, %s945_s19  ;;  %s1292_s14 = smov (!%p526_p13, %s520_s14), 3 }
  0x23   : > { %s510_s25 = scalar_lea.vmem %s1277_s5, %s1290_s13  ;;  %s946_s26 = sshll.u32 %s1292_s14, 6 }
  0x24   : > { %s1208_s29 = scalar_lea.vmem %s1278_s6, %s946_s26  ;;  %549 = sbr.rel (!%p544_p9) target bundleno = 43 (0x2b), region = 44 }
  0x2b PF: > { %s553_s30 = sld [smem:[#allocation5]] }
  0x31   : > { %p925_p0 = scmp.ge.s32.totalorder %s1101_s8, %s553_s30 }
  0x32   : > { %v1028_v1 = vld [vmem:[%s490_s22] sm:$0xff] (!%p925_p0)   ;;  %v1113_v2 = vmov (!%p925_p0), 0.0   ;;  %v1029_v3 = vld [vmem:[%s490_s22 + $0x8] sm:$0xff] (!%p925_p0)   ;;  %vm1114_vm1 = vmmov (!%p925_p0), 0   ;;  %v1115_v6 = vmov (!%p925_p0), 0   ;;  %vm588_vm2 = vcmask (!%p925_p0), 261120  }
  0x33   : > { %557 = sbr.rel (%p925_p0) target bundleno = 513 (0x201), region = 48  ;;  %961 = vmatprep.subr.bf16.mxu0 (!%p925_p0), %v1113_v2  ;;  %969 = vmatprep.subr.bf16.mxu1 (!%p925_p0), %v1113_v2  ;;  %v1030_v4 = vld [vmem:[%s1274_s2] sm:$0xff] (!%p925_p0)   ;;  %v644_v8 = vld [vmem:[%s1194_s18 + $0x8] sm:$0xff] (!%p925_p0)  ;;  %v1033_v10 = vld [vmem:[%s1208_s29 + $0x10] sm:$0xff] (!%p925_p0)  }
  0x34   : > { %962 = vmatpush3.bf16.msra.mxu0 (!%p925_p0), %v1028_v1  ;;  %965 = vmatprep.mubr.msk.bf16.mxu0 (!%p925_p0), %vm1114_vm1, %v1113_v2  ;;  %v643_v5 = vld [vmem:[%s1194_s18] sm:$0xff] (!%p925_p0)  ;;  %v1032_v9 = vld [vmem:[%s1208_s29 + $0x8] sm:$0xff] (!%p925_p0)   ;;  %v1034_v11 = vld [vmem:[%s1208_s29 + $0x18] sm:$0xff] (!%p925_p0)  }
  0x35   : > { %963 = vmatprep.subr.bf16.mxu0 (!%p925_p0), %v1113_v2  ;;  %985 = vmatprep.mubr.msk.bf16.mxu1 (!%p925_p0), %vm1114_vm1, %v1113_v2  ;;  %v1031_v7 = vld [vmem:[%s1208_s29] sm:$0xff] (!%p925_p0)   ;;  %v1036_v13 = vld [vmem:[%s1208_s29 + $0x28] sm:$0xff] (!%p925_p0)   ;;  %v1037_v14 = vld [vmem:[%s1208_s29 + $0x30] sm:$0xff] (!%p925_p0)  }
  0x36   : > { %1027 = vset.pattern.permute.xlu0 (!%p925_p0), %v1115_v6  ;;  %970 = vmatpush3.bf16.msra.mxu1 (!%p925_p0), %v1031_v7  ;;  %v1035_v12 = vld [vmem:[%s1208_s29 + $0x20] sm:$0xff] (!%p925_p0)   ;;  %v1038_v15 = vld [vmem:[%s1208_s29 + $0x38] sm:$0xff] (!%p925_p0)   ;;  %v659_v40 = vld [vmem:[#allocation2 + $0x8] sm:$0xff] (!%p925_p0) }
  0x37   : > { %647 = vperm.xlu0 (!%p925_p0), %1027, %v643_v5   ;;  %971 = vmatprep.subr.bf16.mxu1 (!%p925_p0), %v1113_v2  ;;  %v926_v16 = vld [vmem:[%s510_s25] ss:$0 sm:$0xff] (!%p925_p0) }
  0x38   : > { %964 = vmatpush3.bf16.msra.mxu0 (!%p925_p0), %v1029_v3  ;;  %v658_v38 = vld [vmem:[#allocation2] sm:$0xff] (!%p925_p0) }
  0x3a   : > { %972 = vmatpush3.bf16.msra.mxu1 %v1032_v9 }
  0x3b   : > { %966 = vmatmul.mubr.msk.bf16.vlgmr.msra.gmra.mrb[0].mxu0 %vm588_vm2, %v1030_v4  ;;  %652 = vperm.xlu0 %1027, %v644_v8  }
  0x3c   : > { %973 = vmatprep.subr.bf16.mxu1 %v1113_v2 }
  0x3e   : > { %974 = vmatpush3.bf16.msra.mxu1 %v1033_v10 }
  0x3f   : > { %975 = vmatprep.subr.bf16.mxu1 %v1113_v2 }
  0x42   : > { %976 = vmatpush3.bf16.msra.mxu1 %v1034_v11 }
  0x43   : > { %977 = vmatprep.subr.bf16.mxu1 %v1113_v2 }
  0x46   : > { %978 = vmatpush3.bf16.msra.mxu1 %v1035_v12 }
  0x47   : > { %979 = vmatprep.subr.bf16.mxu1 %v1113_v2 }
  0x4a   : > { %980 = vmatpush3.bf16.msra.mxu1 %v1036_v13 }
  0x4b   : > { %981 = vmatprep.subr.bf16.mxu1 %v1113_v2 }
  0x4e   : > { %982 = vmatpush3.bf16.msra.mxu1 %v1037_v14 }
  0x4f   : > { %983 = vmatprep.subr.bf16.mxu1 %v1113_v2 }
  0x52   : > { %984 = vmatpush3.bf16.msra.mxu1 %v1038_v15 }
  0xb6   : > { %v648_v26 = vpop.permute.xlu0 %647 }
  0xba   : > { %v653_v34 = vpop.permute.xlu0 %652 }
 0x10e   : > { %v626_v17 = vpop.f32.mrb[0].mxu0 }
 0x10f   : > { %v627_v18 = vadd.f32 %v926_v16, %v626_v17  ;;  %v967_v19 = vpop.f32.mrb[1].mxu0 }
 0x110   : > { %v629_v20 = vpop.f32.mrb[2].mxu0 }
 0x111   : > { %v635_v21 = vmul.f32 0.70710677, %v627_v18  ;;  %v630_v22 = vadd.f32 %v926_v16, %v629_v20  ;;  %v968_v23 = vpop.f32.mrb[3].mxu0  ;;  %v633_v27 = vmul.f32 0.5, %v627_v18 }
 0x113   : > { %1039 = verf.f32 %v635_v21  ;;  %v636_v24 = vmul.f32 0.70710677, %v630_v22  ;;  %v634_v30 = vmul.f32 0.5, %v630_v22 }
 0x115   : > { %1041 = verf.f32 %v636_v24 }
 0x11d   : > { %v1040_v25 = vpop.eup %1039 }
 0x11e   : > { %v639_v28 = vadd.f32 1.0, %v1040_v25 }
 0x11f   : > { %v1042_v29 = vpop.eup %1041 }
 0x120   : > { %v641_v31 = vmul.f32 %v639_v28, %v633_v27  ;;  %v640_v32 = vadd.f32 1.0, %v1042_v29 }
 0x122   : > { %v642_v33 = vmul.f32 %v640_v32, %v634_v30  ;;  %v655_v35 = vmul.f32 %v648_v26, %v641_v31 }
 0x124   : > { %v656_v36 = vmul.f32 %v653_v34, %v642_v33 }
 0x126   : > { %v657_v37 = vpack.c.bf16 %v656_v36, %v655_v35 }
 0x128   : > { %986 = vmatmul.mubr.bf16.vlgmr.msra.gmra.mrb[0].mxu1 %v657_v37 }
 0x1fb   : > { %v758_v39 = vpop.f32.mrb[0].mxu1 }
 0x1fc   : > { %v765_v41 = vadd.f32 %v758_v39, %v658_v38  ;;  %v987_v42 = vpop.f32.mrb[1].mxu1 }
 0x1fd   : > { %v761_v43 = vpop.f32.mrb[2].mxu1 }
 0x1fe   : > { %767 = vst.msk [vmem:[#allocation2] sm:$0xff] %vm588_vm2, %v765_v41  ;;  %v766_v44 = vadd.f32 %v761_v43, %v659_v40  ;;  %v988_v45 = vpop.f32.mrb[3].mxu1 }
 0x200   : > { %768 = vst.msk [vmem:[#allocation2 + $0x8] sm:$0xff] %vm588_vm2, %v766_v44 }
 0x201 PF: > { %p769_p1 = scmp.eq.s32.totalorder %s1101_s8, 3 }
 0x202   : > { %vm776_vm3 = vcmask (%p769_p1), 261120  }
 0x203   : > { %773 = sbr.rel (!%p769_p1) target bundleno = 522 (0x20a), region = 52 }
 0x205   : > { %v774_v46 = vld [vmem:[#allocation2] sm:$0xff] (%p769_p1) }
 0x206   : > { %777 = vst.msk [vmem:[#allocation6] sm:$0xff] (%p769_p1), %vm776_vm3, %v774_v46 }
 0x207   : > { %v775_v47 = vld [vmem:[#allocation2 + $0x8] sm:$0xff] (%p769_p1) }
 0x208   : > { %778 = vst.msk [vmem:[#allocation6 + $0x8] sm:$0xff] (%p769_p1), %vm776_vm3, %v775_v47 }
 0x20a PF: > { %p1237_p2 = scmp.eq.s32.totalorder %s913_s1, 3  ;;  %s1116_s16 = smov [#allocation6]  }
 0x20b   : > { %s788_s17 = sshll.u32 %s1116_s16, 4  ;;  %s789_s17 = int_to_ptr.vmem [resolvable:$true] %s788_s17 }
 0x20c   : > { %s1055_s18 = scalar_lea.vmem %s789_s17, 256  ;;  %p1062_p6 = scmp.lt.s32.totalorder %s789_s17, %s789_s17 }
 0x20d   : > { %p1056_p3 = scmp.ne.s32.totalorder %s789_s17, %s1055_s18  ;;  %p1063_p7 = scmp.lt.s32.totalorder %s1055_s18, %s1055_s18 }
 0x20f   : > { %p1057_p4 = pnand %p1056_p3, %p1237_p2  ;;  %p1064_p8 = por %p1063_p7, %p1062_p6 }
 0x211   : > { %p1058_p5 = pneg %p1057_p4 }
 0x213   : > { %p1065_p9 = pnand %p1064_p8, %p1058_p5 }
 0x215   : > { %1068 = shalt.err (!%p1065_p9)
}
 0x216   : > { %s1069_s1 = scalar_lea.hbm %s1279_s7, 256 }
 0x217   : > { %p1070_p10 = scmp.ne.s32.totalorder %s1279_s7, %s1069_s1  ;;  %p1075_p13 = scmp.lt.u32.totalorder %s1069_s1, %s1279_s7 }
 0x219   : > { %p1071_p11 = pnand %p1070_p10, %p1237_p2 }
 0x21b   : > { %p1072_p12 = pneg %p1071_p11 }
 0x21d   : > { %p1077_p0 = pnand %p1075_p13, %p1072_p12 }
 0x21f   : > { %1080 = shalt.err (!%p1077_p0)
}
 0x220   : > { %s1117_s24 = smov 128   ;;  %s1118_s25 = smov 8  }
 0x221   : > { %990 = dma.vmem_to_hbm [thread:$0]  (%p1237_p2), %s789_s17, 256, %s1279_s7, [#allocation7], %s1117_s24, %s1117_s24, %s1118_s25  }
 0x222   : > { %1096 = dma.done.wait (%p1237_p2), [#allocation7], 256  }
 0x223   : > { %1098 = vsyncadd (%p1237_p2), [#allocation7], 4294967040 }
 0x224 PF: > { %s25_s9 = sadd.s32 1, %s1109_s9   ;;  %s1281_s8 = smov %s1105_s0 }
 0x225   : > { %p22_p1 = scmp.ge.s32.totalorder %s25_s9, 6   ;;  %s1282_s0 = smov %s1284_s10 }
 0x227   :  { %24 = sbr.rel (!%p22_p1) target bundleno = 17 (0x11), region = 92 }
 0x22e   :  { %804 = vsyncpa [#allocation7], 1 }
 0x22f   :  { %806 = vsyncpa [#allocation7 + $0x1], 1 }

</bundles_post_ra>
